<compile_context>
chip_gen: v7x
topology: tpu7x:2x2x1
jax: 0.10.0
libtpu: 0.0.40
codegen_flags: <defaults>
</compile_context>

<pallas_src>
import functools

import jax
import jax.numpy as jnp
from jax import lax
from jax.experimental import pallas as pl
from jax.experimental.pallas import tpu as pltpu

_LANES = 128
_SUBLANES = 8
_LOG_CLAMP = -100.0     # PyTorch BCELoss clamps log terms at -100
_SIGMOID_ONE = 17.32868  # f32 sigmoid(x) rounds to exactly 1.0 above ~25*ln(2)
_CHUNK_ROWS = 1024       # in-kernel compute chunk; bounds VMEM temporaries


def _round_up(x, m):
    return ((x + m - 1) // m) * m


def _default_num_splits():
    # Only v7x has 2 TensorCores per chip; a 2-way "parallel" axis on the
    # single-core v5e/v6e just halves the adaptive tile and adds grid steps.
    try:
        kind = jax.devices()[0].device_kind.lower()
    except Exception:
        return 1
    return 2 if ("v7" in kind or "7x" in kind) else 1


def _bce_with_logits_kernel(p_ref, a_ref, o_ref, *, block_rows, chunk_rows,
                            n_chunks, valid_rows):
    """One (block_rows, 128) tile: fused sigmoid + BCE partial sum."""
    c = pl.program_id(0)
    j = pl.program_id(1)
    steps = pl.num_programs(1)

    @pl.when(j == 0)
    def _():
        o_ref[...] = jnp.zeros_like(o_ref)

    # First row this grid step *would* cover (unclamped; the index_map clamps
    # the DMA'd block, the row mask below zeroes anything past `valid_rows`).
    tile_row0 = (c * steps + j) * block_rows
    row_iota = lax.broadcasted_iota(jnp.int32, (chunk_rows, _LANES), 0)

    def chunk_body(i, acc):
        off = pl.multiple_of(i * chunk_rows, _SUBLANES)
        x = p_ref[pl.ds(off, chunk_rows), :].astype(jnp.float32)
        t = a_ref[pl.ds(off, chunk_rows), :].astype(jnp.float32)

        # log(sigmoid(x)) / log(1-sigmoid(x)) straight from the logit:
        # one exp + one log per element instead of sigmoid (exp + recip)
        # followed by two logs.
        softplus = jnp.log(1.0 + jnp.exp(-jnp.abs(x)))
        log_p = jnp.minimum(x, 0.0) - softplus          # log(sigmoid(x))
        log_q = log_p - x                               # log(1 - sigmoid(x))
        # PyTorch parity: BCELoss clamps log terms at -100, and f32 sigmoid
        # saturates to exactly 1.0 for x >= ~17.33, where log(1-p) = -inf
        # would hit the clamp.
        log_p = jnp.maximum(log_p, _LOG_CLAMP)
        log_q = jnp.maximum(log_q, _LOG_CLAMP)
        log_q = jnp.where(x >= _SIGMOID_ONE, _LOG_CLAMP, log_q)

        # Negated BCE term (t*log_p + (1-t)*log_q); the single global negation
        # happens in the XLA epilogue.
        elem = log_q + t * (log_p - log_q)
        # Zero rows past the true extent (partial trailing block / replayed
        # clamped block); select also kills any NaN from OOB garbage.
        elem = jnp.where(row_iota < valid_rows - (tile_row0 + off), elem, 0.0)

        # VPU-only partial reduce into a (8,128) vreg-shaped accumulator.
        return acc + jnp.sum(
            elem.reshape(chunk_rows // _SUBLANES, _SUBLANES, _LANES), axis=0)

    acc = lax.fori_loop(0, n_chunks, chunk_body,
                        jnp.zeros((_SUBLANES, _LANES), jnp.float32))
    o_ref[0] += acc


def loss_with_logits(p, a, *, target_block_rows=8192, num_splits=None,
                     cast_targets_to_bf16=False):
    """Sigmoid(p) followed by BCELoss(reduction='mean') against targets `a`."""
    assert p.shape == a.shape, "prediction / target shape mismatch"
    total = p.size

    if cast_targets_to_bf16 and a.dtype == jnp.float32:
        # Exact for {0,1} masks; halves the target HBM stream (opt-in only,
        # soft targets would lose precision).
        a = a.astype(jnp.bfloat16)

    p_flat = jnp.reshape(p, (-1,))
    a_flat = jnp.reshape(a, (-1,))

    rem = total % _LANES
    if rem:
        # TODO(synk): a fully copy-free ragged tail needs a manual-DMA path;
        # here we only pad to the next lane multiple (<=127 elements).  The
        # pad values (logit=+100, target=1) contribute ~0 loss (<=1e-43 each).
        pad = _LANES - rem
        p_flat = jnp.concatenate(
            [p_flat, jnp.full((pad,), 100.0, dtype=p_flat.dtype)])
        a_flat = jnp.concatenate(
            [a_flat, jnp.ones((pad,), dtype=a_flat.dtype)])
    rows = (total + (_LANES - rem if rem else 0)) // _LANES

    # When rem == 0 these reshapes are layout-preserving bitcasts (no copy).
    p2 = p_flat.reshape(rows, _LANES)
    a2 = a_flat.reshape(rows, _LANES)

    if num_splits is None:
        num_splits = _default_num_splits()
    num_splits = max(1, int(num_splits))
    if rows < num_splits * _SUBLANES:
        num_splits = 1

    # Adaptive tile height: big (8192) for large inputs, shrunk (multiple of 8
    # sublanes) for small ones so the kernel still runs a real tile.
    block_rows = min(target_block_rows,
                     _round_up(pl.cdiv(rows, num_splits), _SUBLANES))
    if block_rows > _CHUNK_ROWS:
        block_rows = _round_up(block_rows, _CHUNK_ROWS)
    chunk_rows = min(block_rows, _CHUNK_ROWS)
    n_chunks = block_rows // chunk_rows

    steps_total = pl.cdiv(rows, block_rows)
    steps = pl.cdiv(steps_total, num_splits)
    last_block = steps_total - 1
    grid = (num_splits, steps)

    def row_block_map(c, j):
        # Clamp so an over-covering final step re-reads the last block instead
        # of going fully out of bounds; the in-kernel row mask zeroes it.
        return (jnp.minimum(c * steps + j, last_block), 0)

    kernel = functools.partial(
        _bce_with_logits_kernel, block_rows=block_rows, chunk_rows=chunk_rows,
        n_chunks=n_chunks, valid_rows=rows)

    bytes_in = (p2.dtype.itemsize + a2.dtype.itemsize) * rows * _LANES
    cost = pl.CostEstimate(
        flops=14 * total,
        transcendentals=2 * total,
        bytes_accessed=bytes_in + num_splits * _SUBLANES * _LANES * 4,
    )

    partials = pl.pallas_call(
        kernel,
        out_shape=jax.ShapeDtypeStruct(
            (num_splits, _SUBLANES, _LANES), jnp.float32),
        grid_spec=pltpu.PrefetchScalarGridSpec(
            num_scalar_prefetch=0,
            grid=grid,
            in_specs=[
                pl.BlockSpec((block_rows, _LANES), row_block_map),
                pl.BlockSpec((block_rows, _LANES), row_block_map),
            ],
            out_specs=pl.BlockSpec((1, _SUBLANES, _LANES),
                                   lambda c, j: (c, 0, 0)),
        ),
        compiler_params=pltpu.CompilerParams(
            dimension_semantics=("parallel", "arbitrary"),
            vmem_limit_bytes=32 * 1024 * 1024,
        ),
        cost_estimate=cost,
    )(p2, a2)

    # Tiny XLA epilogue: final cross-lane reduce, negation, mean over the TRUE
    # element count.  (For >=1e9 elements a second-level fold could tighten
    # f32 accumulation error; not needed at 1e-5 tolerance here.)
    return -jnp.sum(partials) / jnp.float32(total)


def _reference(p, a):
    prob = jax.nn.sigmoid(p.astype(jnp.float32))
    a = a.astype(jnp.float32)
    log_p = jnp.maximum(jnp.log(prob), _LOG_CLAMP)
    log_1mp = jnp.maximum(jnp.log(1.0 - prob), _LOG_CLAMP)
    return jnp.mean(-(a * log_p + (1.0 - a) * log_1mp))


if __name__ == "__main__":
    key = jax.random.PRNGKey(0)
    k1, k2, k3, k4 = jax.random.split(key, 4)

    # Small NCHW-shaped logits / binary targets.
    B, C, H, W = 2, 4, 16, 16
    p = jax.random.normal(k1, (B, C, H, W), dtype=jnp.float32)
    a = (jax.random.uniform(k2, (B, C, H, W)) > 0.5).astype(jnp.float32)

    out = jax.block_until_ready(loss_with_logits(p, a))
    ref = _reference(p, a)
    assert jnp.allclose(out, ref, rtol=1e-5, atol=1e-5), (out, ref)

    # Non-multiple-of-128 size exercises the lane-pad + row-mask path.
    p_odd = jax.random.normal(k3, (2, 3, 15, 17), dtype=jnp.float32)
    a_odd = (jax.random.uniform(k4, (2, 3, 15, 17)) > 0.5).astype(jnp.float32)
    out_odd = jax.block_until_ready(loss_with_logits(p_odd, a_odd))
    ref_odd = _reference(p_odd, a_odd)
    assert jnp.allclose(out_odd, ref_odd, rtol=1e-5, atol=1e-5), (out_odd, ref_odd)

    print("KERNEL_OK")
</pallas_src>

<mosaic_0001>
module attributes {stable_mosaic.version = 11 : i64} {
  func.func @_bce_with_logits_kernel(%arg0: i32, %arg1: i32, %arg2: memref<16x128xf32, #tpu.memory_space<vmem>>, %arg3: memref<16x128xf32, #tpu.memory_space<vmem>>, %arg4: memref<1x8x128xf32, #tpu.memory_space<vmem>>) attributes {dimension_semantics = [#tpu.dimension_semantics<parallel>, #tpu.dimension_semantics<arbitrary>], iteration_bounds = array<i64: 1, 1>, scalar_prefetch = 0 : i64, scratch_operands = 0 : i64, tpu.core_type = #tpu.core_type<tc>, window_params = [{transform_indices = @transform_0, window_bounds = array<i64: 16, 128>}, {transform_indices = @transform_1, window_bounds = array<i64: 16, 128>}, {transform_indices = @transform_2, window_bounds = array<i64: 1, 8, 128>}]} {
    %c0_i32 = arith.constant 0 : i32
    %0 = arith.cmpi eq, %arg1, %c0_i32 : i32
    %1 = arith.extui %0 : i1 to i32
    %c0_i32_0 = arith.constant 0 : i32
    %2 = arith.cmpi ne, %1, %c0_i32_0 : i32
    scf.if %2 {
      %cst_21 = arith.constant 0.000000e+00 : f32
      %51 = vector.broadcast %cst_21 : f32 to vector<1x8x128xf32>
      %c0_22 = arith.constant 0 : index
      %c0_23 = arith.constant 0 : index
      %c0_24 = arith.constant 0 : index
      %52 = vector.load %arg4[%c0_22, %c0_23, %c0_24] : memref<1x8x128xf32, #tpu.memory_space<vmem>>, vector<1x8x128xf32>
      tpu.vector_store %arg4[%c0_22, %c0_23, %c0_24], %51 {strides = array<i32>} : memref<1x8x128xf32, #tpu.memory_space<vmem>>, vector<1x8x128xf32>,
    } else {
    }
    %c1_i32 = arith.constant 1 : i32
    %3 = arith.muli %arg0, %c1_i32 : i32
    %4 = arith.addi %3, %arg1 : i32
    %c16_i32 = arith.constant 16 : i32
    %5 = arith.muli %4, %c16_i32 : i32
    %6 = tpu.iota {dimensions = array<i32: 0>} : vector<16x128xi32>
    %cst = arith.constant 0.000000e+00 : f32
    %7 = vector.broadcast %cst : f32 to vector<8x128xf32>
    %c0_i32_1 = arith.constant 0 : i32
    %c16_i32_2 = arith.constant 16 : i32
    %8 = arith.muli %c0_i32_1, %c16_i32_2 : i32
    %9 = tpu.assume_multiple %8, 8 : i32
    %10 = arith.index_cast %9 : i32 to index
    %c0 = arith.constant 0 : index
    %11 = vector.load %arg2[%10, %c0] : memref<16x128xf32, #tpu.memory_space<vmem>>, vector<16x128xf32>
    %12 = arith.index_cast %9 : i32 to index
    %c0_3 = arith.constant 0 : index
    %13 = vector.load %arg3[%12, %c0_3] : memref<16x128xf32, #tpu.memory_space<vmem>>, vector<16x128xf32>
    %14 = math.absf %11 : vector<16x128xf32>
    %cst_4 = arith.constant 0.000000e+00 : f32
    %15 = vector.broadcast %cst_4 : f32 to vector<16x128xf32>
    %16 = arith.subf %15, %14 : vector<16x128xf32>
    %17 = math.exp %16 : vector<16x128xf32>
    %cst_5 = arith.constant 1.000000e+00 : f32
    %18 = vector.broadcast %cst_5 : f32 to vector<16x128xf32>
    %19 = arith.addf %18, %17 : vector<16x128xf32>
    %20 = math.log %19 : vector<16x128xf32>
    %cst_6 = arith.constant 0.000000e+00 : f32
    %21 = vector.broadcast %cst_6 : f32 to vector<16x128xf32>
    %22 = arith.minimumf %11, %21 : vector<16x128xf32>
    %23 = arith.subf %22, %20 : vector<16x128xf32>
    %24 = arith.subf %23, %11 : vector<16x128xf32>
    %cst_7 = arith.constant -1.000000e+02 : f32
    %25 = vector.broadcast %cst_7 : f32 to vector<16x128xf32>
    %26 = arith.maximumf %23, %25 : vector<16x128xf32>
    %cst_8 = arith.constant -1.000000e+02 : f32
    %27 = vector.broadcast %cst_8 : f32 to vector<16x128xf32>
    %28 = arith.maximumf %24, %27 : vector<16x128xf32>
    %cst_9 = arith.constant 17.32868 : f32
    %29 = vector.broadcast %cst_9 : f32 to vector<16x128xf32>
    %30 = arith.cmpf oge, %11, %29 : vector<16x128xf32>
    %cst_10 = arith.constant -1.000000e+02 : f32
    %31 = vector.broadcast %cst_10 : f32 to vector<16x128xf32>
    %32 = arith.select %30, %31, %28 : vector<16x128xi1>, vector<16x128xf32>
    %33 = arith.subf %26, %32 : vector<16x128xf32>
    %34 = arith.mulf %13, %33 : vector<16x128xf32>
    %35 = arith.addf %32, %34 : vector<16x128xf32>
    %36 = arith.addi %5, %9 : i32
    %c16_i32_11 = arith.constant 16 : i32
    %37 = arith.subi %c16_i32_11, %36 : i32
    %38 = vector.broadcast %37 : i32 to vector<16x128xi32>
    %39 = arith.cmpi slt, %6, %38 : vector<16x128xi32>
    %cst_12 = arith.constant 0.000000e+00 : f32
    %40 = vector.broadcast %cst_12 : f32 to vector<16x128xf32>
    %41 = arith.select %39, %35, %40 : vector<16x128xi1>, vector<16x128xf32>
    %42 = vector.shape_cast %41 : vector<16x128xf32> to vector<2x8x128xf32>
    %cst_13 = arith.constant dense<0.000000e+00> : vector<8x128xf32>
    %43 = vector.multi_reduction <add>, %42, %cst_13 [0] : vector<2x8x128xf32> to vector<8x128xf32>
    %44 = arith.addf %7, %43 : vector<8x128xf32>
    %c1_i32_14 = arith.constant 1 : i32
    %c0_15 = arith.constant 0 : index
    %c0_16 = arith.constant 0 : index
    %c0_17 = arith.constant 0 : index
    %45 = vector.load %arg4[%c0_15, %c0_16, %c0_17] : memref<1x8x128xf32, #tpu.memory_space<vmem>>, vector<1x8x128xf32>
    %46 = vector.shape_cast %45 : vector<1x8x128xf32> to vector<8x128xf32>
    %47 = arith.addf %46, %44 : vector<8x128xf32>
    %c0_18 = arith.constant 0 : index
    %c0_19 = arith.constant 0 : index
    %c0_20 = arith.constant 0 : index
    %48 = vector.load %arg4[%c0_18, %c0_19, %c0_20] : memref<1x8x128xf32, #tpu.memory_space<vmem>>, vector<1x8x128xf32>
    %49 = vector.shape_cast %48 : vector<1x8x128xf32> to vector<8x128xf32>
    %50 = vector.shape_cast %47 : vector<8x128xf32> to vector<1x8x128xf32>
    tpu.vector_store %arg4[%c0_18, %c0_19, %c0_20], %50 {strides = array<i32>} : memref<1x8x128xf32, #tpu.memory_space<vmem>>, vector<1x8x128xf32>,
    return
  }
  func.func @transform_0(%arg0: i32, %arg1: i32) -> (i32, i32) {
    %c1_i32 = arith.constant 1 : i32
    %0 = arith.muli %arg0, %c1_i32 : i32
    %1 = arith.addi %0, %arg1 : i32
    %c0_i32 = arith.constant 0 : i32
    %2 = arith.minsi %1, %c0_i32 : i32
    %c0_i32_0 = arith.constant 0 : i32
    %c0_i32_1 = arith.constant 0 : i32
    return %2, %c0_i32_0 : i32, i32
  }
  func.func @transform_1(%arg0: i32, %arg1: i32) -> (i32, i32) {
    %c1_i32 = arith.constant 1 : i32
    %0 = arith.muli %arg0, %c1_i32 : i32
    %1 = arith.addi %0, %arg1 : i32
    %c0_i32 = arith.constant 0 : i32
    %2 = arith.minsi %1, %c0_i32 : i32
    %c0_i32_0 = arith.constant 0 : i32
    %c0_i32_1 = arith.constant 0 : i32
    return %2, %c0_i32_0 : i32, i32
  }
  func.func @transform_2(%arg0: i32, %arg1: i32) -> (i32, i32, i32) {
    %c0_i32 = arith.constant 0 : i32
    %c0_i32_0 = arith.constant 0 : i32
    %c0_i32_1 = arith.constant 0 : i32
    return %arg0, %c0_i32, %c0_i32_0 : i32, i32, i32
  }
}

</mosaic_0001>

<bundles_post_ra>
// kernel: tpu_custom_call.1
= control target key start
LH: loop header
LB: loop body
LE: loop exit
PB: predicated region body
PF: predicated region fallthrough
CT: control target
= control target key end

     0   :  { %7 = vsyncpa [#allocation3], 0  ;;  %s282_s0 = inlined_call_operand.hbm [shape: f32[16,128], index: 0, kind: input, shape index: {}]   ;;  %s283_s1 = inlined_call_operand.hbm [shape: f32[16,128], index: 1, kind: input, shape index: {}]   ;;  %s284_s2 = inlined_call_operand.hbm [shape: f32[1,8,128], index: 2, kind: output, shape index: {}]  }
   0x1   :  { %8 = vsyncpa [#allocation6], 0 }
   0x2   :  { %9 = vsyncpa [#allocation4], 0  ;;  %s226_s9 = smov [#allocation2]   ;;  %s154_s13 = scalar_lea.hbm %s282_s0, 256 }
   0x3   :  { %s21_s10 = sshll.u32 %s226_s9, 4  ;;  %p155_p0 = scmp.ne.s32.totalorder %s282_s0, %s154_s13  ;;  %s22_s10 = int_to_ptr.vmem [resolvable:$true] %s21_s10 }
   0x4   :  { %p158_p1 = scmp.lt.u32.totalorder %s154_s13, %s282_s0 }
   0x6   :  { %p160_p2 = pnand %p158_p1, %p155_p0 }
   0x8   :  { %163 = shalt.err (!%p160_p2)
}
   0x9   :  { %s164_s18 = scalar_lea.vmem %s22_s10, 256  ;;  %p169_p4 = scmp.lt.s32.totalorder %s22_s10, %s22_s10 }
   0xa   :  { %p165_p3 = scmp.ne.s32.totalorder %s22_s10, %s164_s18  ;;  %p170_p5 = scmp.lt.s32.totalorder %s164_s18, %s164_s18 }
   0xc   :  { %p171_p6 = por %p170_p5, %p169_p4 }
   0xe   :  { %p172_p7 = pnand %p171_p6, %p165_p3 }
  0x10   :  { %175 = shalt.err (!%p172_p7)
}
  0x11   :  { %s227_s19 = smov 128   ;;  %s228_s20 = smov 8  }
  0x12   :  { %27 = dma.hbm_to_vmem [thread:$0]  %s282_s0, 256, %s22_s10, [#allocation3], %s227_s19, %s227_s19, %s228_s20  }
  0x13   :  { %s229_s23 = smov [#allocation5]   ;;  %s176_s27 = scalar_lea.hbm %s283_s1, 256 }
  0x14   :  { %s39_s24 = sshll.u32 %s229_s23, 4  ;;  %p177_p8 = scmp.ne.s32.totalorder %s283_s1, %s176_s27  ;;  %s40_s24 = int_to_ptr.vmem [resolvable:$true] %s39_s24 }
  0x15   :  { %p180_p9 = scmp.lt.u32.totalorder %s176_s27, %s283_s1 }
  0x17   :  { %p182_p10 = pnand %p180_p9, %p177_p8 }
  0x19   :  { %185 = shalt.err (!%p182_p10)
}
  0x1a   :  { %s186_s4 = scalar_lea.vmem %s40_s24, 256  ;;  %p191_p12 = scmp.lt.s32.totalorder %s40_s24, %s40_s24 }
  0x1b   :  { %p187_p11 = scmp.ne.s32.totalorder %s40_s24, %s186_s4  ;;  %p192_p13 = scmp.lt.s32.totalorder %s186_s4, %s186_s4 }
  0x1d   :  { %p193_p0 = por %p192_p13, %p191_p12 }
  0x1f   :  { %p194_p1 = pnand %p193_p0, %p187_p11 }
  0x21   :  { %197 = shalt.err (!%p194_p1)
}
  0x22   :  { %45 = dma.hbm_to_vmem [thread:$0]  %s283_s1, 256, %s40_s24, [#allocation6], %s227_s19, %s227_s19, %s228_s20  }
  0x23   :  { %220 = dma.done.wait [#allocation3], 256  }
  0x24   :  { %221 = vsyncadd [#allocation3], 4294967040 }
  0x25   :  { %222 = dma.done.wait [#allocation6], 256  }
  0x26   :  { %223 = vsyncadd [#allocation6], 4294967040  ;;  %v70_v0 = vld [vmem:[#allocation2] sm:$0xff]  ;;  %v71_v1 = vld [vmem:[#allocation2 + $0x8] sm:$0xff]  ;;  %s230_s1 = smov [#allocation7]  }
  0x27   :  { %v74_v2 = vand.u32 2147483647, %v70_v0  ;;  %v75_v3 = vand.u32 2147483647, %v71_v1  ;;  %v88_v12 = vmin.f32 %v70_v0, 0.0  ;;  %v89_v14 = vmin.f32 %v71_v1, 0.0 }
  0x28   :  { %vm98_vm0 = vcmp.ge.f32.partialorder %v70_v0, 17.32868  ;;  %vm99_vm1 = vcmp.ge.f32.partialorder %v71_v1, 17.32868  ;;  %v72_v26 = vld [vmem:[#allocation5] sm:$0xff]  ;;  %v73_v28 = vld [vmem:[#allocation5 + $0x8] sm:$0xff] }
  0x29   :  { %v76_v4 = vsub.f32 0.0, %v74_v2  ;;  %v77_v5 = vsub.f32 0.0, %v75_v3  ;;  %s126_s6 = sshll.u32 %s230_s1, 4  ;;  %s127_s6 = int_to_ptr.vmem [resolvable:$true] %s126_s6 }
  0x2a   :  { %s198_s7 = scalar_lea.vmem %s127_s6, 128  ;;  %p203_p3 = scmp.lt.s32.totalorder %s127_s6, %s127_s6 }
  0x2b   :  { %v78_v6 = vmul.f32 1.442695, %v76_v4  ;;  %v80_v7 = vmul.f32 1.442695, %v77_v5  ;;  %p199_p2 = scmp.ne.s32.totalorder %s127_s6, %s198_s7  ;;  %p204_p4 = scmp.lt.s32.totalorder %s198_s7, %s198_s7 }
  0x2d   :  { %146 = vpow2.f32 %v78_v6  ;;  %p205_p5 = por %p204_p4, %p203_p3 }
  0x2e   :  { %148 = vpow2.f32 %v80_v7 }
  0x2f   :  { %p206_p6 = pnand %p205_p5, %p199_p2 }
  0x37   :  { %v147_v8 = vpop.eup %146 }
  0x38   :  { %v149_v9 = vpop.eup %148  ;;  %v82_v10 = vadd.f32 1.0, %v147_v8 }
  0x39   :  { %v83_v11 = vadd.f32 1.0, %v149_v9 }
  0x3a   :  { %150 = vlog2.f32 %v82_v10 }
  0x3b   :  { %152 = vlog2.f32 %v83_v11 }
  0x44   :  { %v151_v13 = vpop.eup %150 }
  0x45   :  { %v153_v15 = vpop.eup %152  ;;  %v85_v16 = vmul.f32 0.6931472, %v151_v13 }
  0x46   :  { %v87_v17 = vmul.f32 0.6931472, %v153_v15 }
  0x47   :  { %v90_v18 = vsub.f32 %v88_v12, %v85_v16 }
  0x48   :  { %v91_v19 = vsub.f32 %v89_v14, %v87_v17 }
  0x49   :  { %v92_v20 = vsub.f32 %v90_v18, %v70_v0  ;;  %v94_v22 = vmax.f32 %v90_v18, -100.0 }
  0x4a   :  { %v93_v21 = vsub.f32 %v91_v19, %v71_v1  ;;  %v95_v23 = vmax.f32 %v91_v19, -100.0 }
  0x4b   :  { %v96_v24 = vmax.f32 %v92_v20, -100.0 }
  0x4c   :  { %v97_v25 = vmax.f32 %v93_v21, -100.0 }
  0x4d   :  { %v100_v27 = vsel %vm98_vm0, -100.0, %v96_v24 }
  0x4e   :  { %v101_v29 = vsel %vm99_vm1, -100.0, %v97_v25  ;;  %v102_v30 = vsub.f32 %v94_v22, %v100_v27 }
  0x4f   :  { %v103_v31 = vsub.f32 %v95_v23, %v101_v29 }
  0x50   :  { %v104_v32 = vmul.f32 %v102_v30, %v72_v26 }
  0x51   :  { %v105_v33 = vmul.f32 %v103_v31, %v73_v28 }
  0x52   :  { %v106_v34 = vadd.f32 %v104_v32, %v100_v27 }
  0x53   :  { %v107_v35 = vadd.f32 %v105_v33, %v101_v29 }
  0x55   :  { %v115_v36 = vadd.f32 %v107_v35, %v106_v34 }
  0x57   :  { %119 = vst [vmem:[#allocation7] sm:$0xff] %v115_v36 }
  0x58   :  { %209 = shalt.err (!%p206_p6)
}
  0x59   :  { %s210_s10 = scalar_lea.hbm %s284_s2, 128 }
  0x5a   :  { %p211_p7 = scmp.ne.s32.totalorder %s284_s2, %s210_s10  ;;  %p214_p8 = scmp.lt.u32.totalorder %s210_s10, %s284_s2 }
  0x5c   :  { %p216_p9 = pnand %p214_p8, %p211_p7 }
  0x5e   :  { %219 = shalt.err (!%p216_p9)
}
  0x5f   :  { %129 = dma.vmem_to_hbm [thread:$0]  %s127_s6, 128, %s284_s2, [#allocation4]  }
  0x60   :  { %224 = dma.done.wait [#allocation4], 128  }
  0x61   :  { %225 = vsyncadd [#allocation4], 4294967168 }
  0x62   :  { %133 = vsyncpa [#allocation3], 1 }
  0x63   :  { %134 = vsyncpa [#allocation6], 1 }
  0x64   :  { %135 = vsyncpa [#allocation4], 1 }

</bundles_post_ra>
